<compile_context>
chip_gen: v5e
topology: v5e:2x2
jax: 0.10.0
libtpu: 0.0.40
codegen_flags: <defaults>
</compile_context>

<pallas_src>
import functools

import jax
import jax.numpy as jnp
from jax import lax
from jax.experimental import pallas as pl
from jax.experimental.pallas import tpu as pltpu

_BN_EPS = 1e-5
_LANE = 128


def _round_up(x: int, m: int) -> int:
    return ((x + m - 1) // m) * m


# ----------------------------------------------------------------------------
# Shared math (used by both the Pallas kernel and the pure-JAX reference).
# ----------------------------------------------------------------------------
def _ff_compute(x, params, *, num_hidden, use_bn):
    """x: f32 [N, Fin] (unpadded). Returns f32 [N, Fout_p].

    Weights are stored in torch orientation [out, in]; matmuls contract the
    last dims of both operands (lhs [N, K] x rhs [Nout, K] -> [N, Nout]), the
    same MXU-friendly pattern as q @ k^T in attention kernels.
    """
    if use_bn:
        (g_in, be_in, w_in, b_in,
         g_h, be_h, w_h, b_h,
         g_o, be_o, w_o, b_o) = params
    else:
        (w_in, b_in, w_h, b_h, w_o, b_o) = params
        g_in = be_in = g_h = be_h = g_o = be_o = None

    inv_n = jnp.float32(1.0 / x.shape[0])
    dn = (((1,), (1,)), ((), ()))            # contract last dims of lhs & rhs

    def layer(h, gamma, beta, w_t, bias, *, act):
        # h: f32 [N, K]; w_t: [Nout, K] (f32 if use_bn else bf16); bias [1, Nout].
        if use_bn:
            # Training-mode BatchNorm1d (batch mean, biased variance), folded
            # into the matmul: only O(K*Nout) work on the weight, no O(N*K)
            # normalization pass over the activations.
            s1 = jnp.sum(h, axis=0, keepdims=True)
            s2 = jnp.sum(h * h, axis=0, keepdims=True)
            mean = s1 * inv_n
            var = jnp.maximum(s2 * inv_n - mean * mean, 0.0)    # biased var
            scale = gamma * lax.rsqrt(var + _BN_EPS)            # [1, K]
            shift = beta - mean * scale                         # [1, K]
            w_eff = (w_t * scale).astype(jnp.bfloat16)          # [Nout, K]
            b_eff = lax.dot_general(shift, w_t, dn,
                                    preferred_element_type=jnp.float32) + bias
        else:
            w_eff = w_t                                         # already bf16
            b_eff = bias
        y = lax.dot_general(h.astype(jnp.bfloat16), w_eff, dn,
                            preferred_element_type=jnp.float32)
        y = y + b_eff
        if act:
            y = jnp.tanh(y)
        return y

    h = layer(x, g_in, be_in, w_in, b_in, act=True)

    def hidden_body(_, carry):          # shared hidden block, applied repeatedly
        return layer(carry, g_h, be_h, w_h, b_h, act=True)

    h = lax.fori_loop(0, num_hidden - 1, hidden_body, h, unroll=True)

    return layer(h, g_o, be_o, w_o, b_o, act=False)


# ----------------------------------------------------------------------------
# Fused kernel
# ----------------------------------------------------------------------------
def _feedforward_kernel(x_ref, *rest, num_hidden, use_bn):
    *param_refs, o_ref = rest
    params = tuple(r[...] for r in param_refs)   # parameter loads hoisted (once)
    x = x_ref[...].astype(jnp.float32)
    out = _ff_compute(x, params, num_hidden=num_hidden, use_bn=use_bn)
    o_ref[...] = out.astype(o_ref.dtype)


def _vmem_limit_bytes() -> int:
    # Generation-aware scoped-VMEM limit: ~75% of physical VMEM.
    try:
        cap = int(pltpu.get_tpu_info().vmem_capacity_bytes)
    except Exception:
        cap = 64 * 1024 * 1024
    return max(cap * 3 // 4, 32 * 1024 * 1024)


@functools.partial(jax.jit, static_argnames=("num_hidden", "use_bn", "out_dim"))
def _feedforward_forward(x, params, *, num_hidden, use_bn, out_dim):
    n = x.shape[0]
    w_in = params[2] if use_bn else params[0]
    w_h = params[6] if use_bn else params[2]
    w_o = params[-2]
    hid_p = w_in.shape[0]
    fout_p = w_o.shape[0]

    flops = 2 * n * (w_in.shape[0] * w_in.shape[1]
                     + (num_hidden - 1) * w_h.shape[0] * w_h.shape[1]
                     + w_o.shape[0] * w_o.shape[1])
    transcendentals = n * hid_p * num_hidden
    bytes_accessed = (x.size * x.dtype.itemsize
                      + sum(p.size * p.dtype.itemsize for p in params)
                      + n * fout_p * 4)

    kernel = functools.partial(_feedforward_kernel, num_hidden=num_hidden,
                               use_bn=use_bn)

    # Single fused invocation (no grid): whole batch + all parameters are
    # VMEM-resident whole blocks, nothing to pipeline / double-buffer.
    out_p = pl.pallas_call(
        kernel,
        out_shape=jax.ShapeDtypeStruct((n, fout_p), jnp.float32),
        compiler_params=pltpu.CompilerParams(
            vmem_limit_bytes=_vmem_limit_bytes()),
        cost_estimate=pl.CostEstimate(
            flops=int(flops),
            transcendentals=int(transcendentals),
            bytes_accessed=int(bytes_accessed)),
    )(x, *params)
    return out_p[:, :out_dim]


# ----------------------------------------------------------------------------
# Parameter construction (mimics torch defaults) and module wrapper
# ----------------------------------------------------------------------------
def _init_linear(key, in_dim, out_dim, in_store, out_store, dtype):
    """torch.nn.Linear init: U(+-1/sqrt(fan_in)).  Stored in torch orientation
    [out, in], zero-padded to the lane-dense storage shape (result-preserving:
    padded rows/columns are exactly zero)."""
    kw, kb = jax.random.split(key)
    bound = 1.0 / float(in_dim) ** 0.5
    w = jax.random.uniform(kw, (out_dim, in_dim), jnp.float32, -bound, bound)
    b = jax.random.uniform(kb, (out_dim,), jnp.float32, -bound, bound)
    w_p = jnp.zeros((out_store, in_store), jnp.float32).at[:out_dim, :in_dim].set(w)
    b_p = jnp.zeros((1, out_store), jnp.float32).at[0, :out_dim].set(b)
    return w_p.astype(dtype), b_p


def _init_bn(dim_store):
    # BatchNorm1d init: gamma=1, beta=0.  Padded lanes are harmless because
    # their corresponding weight rows are zero, so they never contribute.
    return (jnp.ones((1, dim_store), jnp.float32),
            jnp.zeros((1, dim_store), jnp.float32))


class FeedForwardPallas:
    def __init__(self, input_dim, output_dim, num_hidden, hidden_dim,
                 use_batch_norm=True, seed=0):
        self.input_dim = input_dim
        self.output_dim = output_dim
        self.num_hidden = num_hidden
        self.use_bn = use_batch_norm

        hid_p = _round_up(hidden_dim, _LANE)
        fout_p = _round_up(output_dim, _LANE)
        # With BN the weights are rescaled in-kernel each layer (keep an f32
        # master, cast to bf16 after scaling); without BN the stored weight IS
        # the MXU operand -> store bf16 directly.
        w_dtype = jnp.float32 if use_batch_norm else jnp.bfloat16

        key = jax.random.PRNGKey(seed)
        k_in, k_hid, k_out = jax.random.split(key, 3)

        # Input-layer weight keeps its *in* dim unpadded so the raw, unpadded x
        # contracts against it directly (no wrapper-side pad copy of x).
        w_in, b_in = _init_linear(k_in, input_dim, hidden_dim,
                                  input_dim, hid_p, w_dtype)
        # Single shared hidden block (PyTorch list multiplication shares modules).
        w_h, b_h = _init_linear(k_hid, hidden_dim, hidden_dim,
                                hid_p, hid_p, w_dtype)
        w_o, b_o = _init_linear(k_out, hidden_dim, output_dim,
                                hid_p, fout_p, w_dtype)

        if use_batch_norm:
            g_in, be_in = _init_bn(input_dim)
            g_h, be_h = _init_bn(hid_p)
            g_o, be_o = _init_bn(hid_p)
            self._params = (g_in, be_in, w_in, b_in,
                            g_h, be_h, w_h, b_h,
                            g_o, be_o, w_o, b_o)
        else:
            # BN params are skipped entirely (no dead DMAs).
            self._params = (w_in, b_in, w_h, b_h, w_o, b_o)

    def __call__(self, x):
        return _feedforward_forward(x, self._params,
                                    num_hidden=self.num_hidden,
                                    use_bn=self.use_bn,
                                    out_dim=self.output_dim)

    def reference(self, x):
        """Pure-JAX (non-Pallas) forward, same math, for sanity checking."""
        out = _ff_compute(x.astype(jnp.float32), self._params,
                          num_hidden=self.num_hidden, use_bn=self.use_bn)
        return out[:, :self.output_dim]


if __name__ == "__main__":
    # batch=6, input_dim=16, hidden_dim=32, output_dim=4, 3 hidden layers
    batch, input_dim, output_dim, num_hidden, hidden_dim = 6, 16, 4, 3, 32
    key = jax.random.PRNGKey(0)
    x = jax.random.normal(key, (batch, input_dim), jnp.float32)

    model = FeedForwardPallas(input_dim, output_dim, num_hidden, hidden_dim,
                              use_batch_norm=True, seed=0)
    out = jax.block_until_ready(model(x))
    assert out.shape == (batch, output_dim)
    assert out.dtype == jnp.float32
    assert bool(jnp.all(jnp.isfinite(out)))

    ref = jax.block_until_ready(model.reference(x))
    assert jnp.allclose(out, ref, atol=1e-2, rtol=1e-2), \
        float(jnp.max(jnp.abs(out - ref)))

    # Also exercise the use_batch_norm=False variant (no BN params passed).
    model2 = FeedForwardPallas(input_dim, output_dim, num_hidden, hidden_dim,
                               use_batch_norm=False, seed=1)
    out2 = jax.block_until_ready(model2(x))
    assert out2.shape == (batch, output_dim)
    assert bool(jnp.all(jnp.isfinite(out2)))

    print("KERNEL_OK")
</pallas_src>

<mosaic_0001>
module attributes {stable_mosaic.version = 11 : i64} {
  func.func @_feedforward_kernel(%arg0: memref<6x16xf32, #tpu.memory_space<vmem>>, %arg1: memref<1x16xf32, #tpu.memory_space<vmem>>, %arg2: memref<1x16xf32, #tpu.memory_space<vmem>>, %arg3: memref<128x16xf32, #tpu.memory_space<vmem>>, %arg4: memref<1x128xf32, #tpu.memory_space<vmem>>, %arg5: memref<1x128xf32, #tpu.memory_space<vmem>>, %arg6: memref<1x128xf32, #tpu.memory_space<vmem>>, %arg7: memref<128x128xf32, #tpu.memory_space<vmem>>, %arg8: memref<1x128xf32, #tpu.memory_space<vmem>>, %arg9: memref<1x128xf32, #tpu.memory_space<vmem>>, %arg10: memref<1x128xf32, #tpu.memory_space<vmem>>, %arg11: memref<128x128xf32, #tpu.memory_space<vmem>>, %arg12: memref<1x128xf32, #tpu.memory_space<vmem>>, %arg13: memref<6x128xf32, #tpu.memory_space<vmem>>) attributes {dimension_semantics = [], scalar_prefetch = 0 : i64, scratch_operands = 0 : i64, tpu.core_type = #tpu.core_type<tc>} {
    %c0 = arith.constant 0 : index
    %c0_0 = arith.constant 0 : index
    %0 = vector.load %arg1[%c0, %c0_0] : memref<1x16xf32, #tpu.memory_space<vmem>>, vector<1x16xf32>
    %c0_1 = arith.constant 0 : index
    %c0_2 = arith.constant 0 : index
    %1 = vector.load %arg2[%c0_1, %c0_2] : memref<1x16xf32, #tpu.memory_space<vmem>>, vector<1x16xf32>
    %c0_3 = arith.constant 0 : index
    %c0_4 = arith.constant 0 : index
    %2 = vector.load %arg3[%c0_3, %c0_4] : memref<128x16xf32, #tpu.memory_space<vmem>>, vector<128x16xf32>
    %c0_5 = arith.constant 0 : index
    %c0_6 = arith.constant 0 : index
    %3 = vector.load %arg4[%c0_5, %c0_6] : memref<1x128xf32, #tpu.memory_space<vmem>>, vector<1x128xf32>
    %c0_7 = arith.constant 0 : index
    %c0_8 = arith.constant 0 : index
    %4 = vector.load %arg5[%c0_7, %c0_8] : memref<1x128xf32, #tpu.memory_space<vmem>>, vector<1x128xf32>
    %c0_9 = arith.constant 0 : index
    %c0_10 = arith.constant 0 : index
    %5 = vector.load %arg6[%c0_9, %c0_10] : memref<1x128xf32, #tpu.memory_space<vmem>>, vector<1x128xf32>
    %c0_11 = arith.constant 0 : index
    %c0_12 = arith.constant 0 : index
    %6 = vector.load %arg7[%c0_11, %c0_12] : memref<128x128xf32, #tpu.memory_space<vmem>>, vector<128x128xf32>
    %c0_13 = arith.constant 0 : index
    %c0_14 = arith.constant 0 : index
    %7 = vector.load %arg8[%c0_13, %c0_14] : memref<1x128xf32, #tpu.memory_space<vmem>>, vector<1x128xf32>
    %c0_15 = arith.constant 0 : index
    %c0_16 = arith.constant 0 : index
    %8 = vector.load %arg9[%c0_15, %c0_16] : memref<1x128xf32, #tpu.memory_space<vmem>>, vector<1x128xf32>
    %c0_17 = arith.constant 0 : index
    %c0_18 = arith.constant 0 : index
    %9 = vector.load %arg10[%c0_17, %c0_18] : memref<1x128xf32, #tpu.memory_space<vmem>>, vector<1x128xf32>
    %c0_19 = arith.constant 0 : index
    %c0_20 = arith.constant 0 : index
    %10 = vector.load %arg11[%c0_19, %c0_20] : memref<128x128xf32, #tpu.memory_space<vmem>>, vector<128x128xf32>
    %c0_21 = arith.constant 0 : index
    %c0_22 = arith.constant 0 : index
    %11 = vector.load %arg12[%c0_21, %c0_22] : memref<1x128xf32, #tpu.memory_space<vmem>>, vector<1x128xf32>
    %c0_23 = arith.constant 0 : index
    %c0_24 = arith.constant 0 : index
    %12 = vector.load %arg0[%c0_23, %c0_24] : memref<6x16xf32, #tpu.memory_space<vmem>>, vector<6x16xf32>
    %cst = arith.constant dense<0.000000e+00> : vector<16xf32>
    %13 = vector.multi_reduction <add>, %12, %cst [0] : vector<6x16xf32> to vector<16xf32>
    %14 = vector.shape_cast %13 : vector<16xf32> to vector<1x16xf32>
    %15 = arith.mulf %12, %12 : vector<6x16xf32>
    %cst_25 = arith.constant dense<0.000000e+00> : vector<16xf32>
    %16 = vector.multi_reduction <add>, %15, %cst_25 [0] : vector<6x16xf32> to vector<16xf32>
    %17 = vector.shape_cast %16 : vector<16xf32> to vector<1x16xf32>
    %cst_26 = arith.constant 0.166666672 : f32
    %18 = vector.broadcast %cst_26 : f32 to vector<1x16xf32>
    %19 = arith.mulf %14, %18 : vector<1x16xf32>
    %cst_27 = arith.constant 0.166666672 : f32
    %20 = vector.broadcast %cst_27 : f32 to vector<1x16xf32>
    %21 = arith.mulf %17, %20 : vector<1x16xf32>
    %22 = arith.mulf %19, %19 : vector<1x16xf32>
    %23 = arith.subf %21, %22 : vector<1x16xf32>
    %cst_28 = arith.constant 0.000000e+00 : f32
    %24 = vector.broadcast %cst_28 : f32 to vector<1x16xf32>
    %25 = arith.maximumf %23, %24 : vector<1x16xf32>
    %cst_29 = arith.constant 9.99999974E-6 : f32
    %26 = vector.broadcast %cst_29 : f32 to vector<1x16xf32>
    %27 = arith.addf %25, %26 : vector<1x16xf32>
    %28 = math.rsqrt %27 : vector<1x16xf32>
    %29 = arith.mulf %0, %28 : vector<1x16xf32>
    %30 = arith.mulf %19, %29 : vector<1x16xf32>
    %31 = arith.subf %1, %30 : vector<1x16xf32>
    %32 = vector.broadcast %29 : vector<1x16xf32> to vector<128x16xf32>
    %33 = arith.mulf %2, %32 : vector<128x16xf32>
    %34 = arith.truncf %33 : vector<128x16xf32> to vector<128x16xbf16>
    %cst_30 = arith.constant dense<0.000000e+00> : vector<1x128xf32>
    %35 = tpu.matmul %31, %2, %cst_30 {dimension_numbers = #tpu.dot_dimension_numbers<[1], [1], [0], [0], [0, 0, 1, 0], [], []>} : vector<1x16xf32>, vector<128x16xf32>, vector<1x128xf32> -> vector<1x128xf32>
    %36 = arith.addf %35, %3 : vector<1x128xf32>
    %37 = arith.truncf %12 : vector<6x16xf32> to vector<6x16xbf16>
    %cst_31 = arith.constant dense<0.000000e+00> : vector<6x128xf32>
    %38 = tpu.matmul %37, %34, %cst_31 {dimension_numbers = #tpu.dot_dimension_numbers<[1], [1], [0], [0], [0, 0, 1, 0], [], []>} : vector<6x16xbf16>, vector<128x16xbf16>, vector<6x128xf32> -> vector<6x128xf32>
    %39 = vector.broadcast %36 : vector<1x128xf32> to vector<6x128xf32>
    %40 = arith.addf %38, %39 : vector<6x128xf32>
    %41 = math.tanh %40 : vector<6x128xf32>
    %cst_32 = arith.constant 0.166666672 : f32
    %c0_i32 = arith.constant 0 : i32
    %cst_33 = arith.constant dense<0.000000e+00> : vector<128xf32>
    %42 = vector.multi_reduction <add>, %41, %cst_33 [0] : vector<6x128xf32> to vector<128xf32>
    %43 = vector.shape_cast %42 : vector<128xf32> to vector<1x128xf32>
    %44 = arith.mulf %41, %41 : vector<6x128xf32>
    %cst_34 = arith.constant dense<0.000000e+00> : vector<128xf32>
    %45 = vector.multi_reduction <add>, %44, %cst_34 [0] : vector<6x128xf32> to vector<128xf32>
    %46 = vector.shape_cast %45 : vector<128xf32> to vector<1x128xf32>
    %47 = vector.broadcast %cst_32 : f32 to vector<1x128xf32>
    %48 = arith.mulf %43, %47 : vector<1x128xf32>
    %49 = vector.broadcast %cst_32 : f32 to vector<1x128xf32>
    %50 = arith.mulf %46, %49 : vector<1x128xf32>
    %51 = arith.mulf %48, %48 : vector<1x128xf32>
    %52 = arith.subf %50, %51 : vector<1x128xf32>
    %cst_35 = arith.constant 0.000000e+00 : f32
    %53 = vector.broadcast %cst_35 : f32 to vector<1x128xf32>
    %54 = arith.maximumf %52, %53 : vector<1x128xf32>
    %cst_36 = arith.constant 9.99999974E-6 : f32
    %55 = vector.broadcast %cst_36 : f32 to vector<1x128xf32>
    %56 = arith.addf %54, %55 : vector<1x128xf32>
    %57 = math.rsqrt %56 : vector<1x128xf32>
    %58 = arith.mulf %4, %57 : vector<1x128xf32>
    %59 = arith.mulf %48, %58 : vector<1x128xf32>
    %60 = arith.subf %5, %59 : vector<1x128xf32>
    %61 = vector.broadcast %58 : vector<1x128xf32> to vector<128x128xf32>
    %62 = arith.mulf %6, %61 : vector<128x128xf32>
    %63 = arith.truncf %62 : vector<128x128xf32> to vector<128x128xbf16>
    %cst_37 = arith.constant dense<0.000000e+00> : vector<1x128xf32>
    %64 = tpu.matmul %60, %6, %cst_37 {dimension_numbers = #tpu.dot_dimension_numbers<[1], [1], [0], [0], [0, 0, 1, 0], [], []>} : vector<1x128xf32>, vector<128x128xf32>, vector<1x128xf32> -> vector<1x128xf32>
    %65 = arith.addf %64, %7 : vector<1x128xf32>
    %66 = arith.truncf %41 : vector<6x128xf32> to vector<6x128xbf16>
    %cst_38 = arith.constant dense<0.000000e+00> : vector<6x128xf32>
    %67 = tpu.matmul %66, %63, %cst_38 {dimension_numbers = #tpu.dot_dimension_numbers<[1], [1], [0], [0], [0, 0, 1, 0], [], []>} : vector<6x128xbf16>, vector<128x128xbf16>, vector<6x128xf32> -> vector<6x128xf32>
    %68 = vector.broadcast %65 : vector<1x128xf32> to vector<6x128xf32>
    %69 = arith.addf %67, %68 : vector<6x128xf32>
    %70 = math.tanh %69 : vector<6x128xf32>
    %c1_i32 = arith.constant 1 : i32
    %cst_39 = arith.constant dense<0.000000e+00> : vector<128xf32>
    %71 = vector.multi_reduction <add>, %70, %cst_39 [0] : vector<6x128xf32> to vector<128xf32>
    %72 = vector.shape_cast %71 : vector<128xf32> to vector<1x128xf32>
    %73 = arith.mulf %70, %70 : vector<6x128xf32>
    %cst_40 = arith.constant dense<0.000000e+00> : vector<128xf32>
    %74 = vector.multi_reduction <add>, %73, %cst_40 [0] : vector<6x128xf32> to vector<128xf32>
    %75 = vector.shape_cast %74 : vector<128xf32> to vector<1x128xf32>
    %76 = vector.broadcast %cst_32 : f32 to vector<1x128xf32>
    %77 = arith.mulf %72, %76 : vector<1x128xf32>
    %78 = vector.broadcast %cst_32 : f32 to vector<1x128xf32>
    %79 = arith.mulf %75, %78 : vector<1x128xf32>
    %80 = arith.mulf %77, %77 : vector<1x128xf32>
    %81 = arith.subf %79, %80 : vector<1x128xf32>
    %cst_41 = arith.constant 0.000000e+00 : f32
    %82 = vector.broadcast %cst_41 : f32 to vector<1x128xf32>
    %83 = arith.maximumf %81, %82 : vector<1x128xf32>
    %cst_42 = arith.constant 9.99999974E-6 : f32
    %84 = vector.broadcast %cst_42 : f32 to vector<1x128xf32>
    %85 = arith.addf %83, %84 : vector<1x128xf32>
    %86 = math.rsqrt %85 : vector<1x128xf32>
    %87 = arith.mulf %4, %86 : vector<1x128xf32>
    %88 = arith.mulf %77, %87 : vector<1x128xf32>
    %89 = arith.subf %5, %88 : vector<1x128xf32>
    %90 = vector.broadcast %87 : vector<1x128xf32> to vector<128x128xf32>
    %91 = arith.mulf %6, %90 : vector<128x128xf32>
    %92 = arith.truncf %91 : vector<128x128xf32> to vector<128x128xbf16>
    %cst_43 = arith.constant dense<0.000000e+00> : vector<1x128xf32>
    %93 = tpu.matmul %89, %6, %cst_43 {dimension_numbers = #tpu.dot_dimension_numbers<[1], [1], [0], [0], [0, 0, 1, 0], [], []>} : vector<1x128xf32>, vector<128x128xf32>, vector<1x128xf32> -> vector<1x128xf32>
    %94 = arith.addf %93, %7 : vector<1x128xf32>
    %95 = arith.truncf %70 : vector<6x128xf32> to vector<6x128xbf16>
    %cst_44 = arith.constant dense<0.000000e+00> : vector<6x128xf32>
    %96 = tpu.matmul %95, %92, %cst_44 {dimension_numbers = #tpu.dot_dimension_numbers<[1], [1], [0], [0], [0, 0, 1, 0], [], []>} : vector<6x128xbf16>, vector<128x128xbf16>, vector<6x128xf32> -> vector<6x128xf32>
    %97 = vector.broadcast %94 : vector<1x128xf32> to vector<6x128xf32>
    %98 = arith.addf %96, %97 : vector<6x128xf32>
    %99 = math.tanh %98 : vector<6x128xf32>
    %cst_45 = arith.constant dense<0.000000e+00> : vector<128xf32>
    %100 = vector.multi_reduction <add>, %99, %cst_45 [0] : vector<6x128xf32> to vector<128xf32>
    %101 = vector.shape_cast %100 : vector<128xf32> to vector<1x128xf32>
    %102 = arith.mulf %99, %99 : vector<6x128xf32>
    %cst_46 = arith.constant dense<0.000000e+00> : vector<128xf32>
    %103 = vector.multi_reduction <add>, %102, %cst_46 [0] : vector<6x128xf32> to vector<128xf32>
    %104 = vector.shape_cast %103 : vector<128xf32> to vector<1x128xf32>
    %cst_47 = arith.constant 0.166666672 : f32
    %105 = vector.broadcast %cst_47 : f32 to vector<1x128xf32>
    %106 = arith.mulf %101, %105 : vector<1x128xf32>
    %cst_48 = arith.constant 0.166666672 : f32
    %107 = vector.broadcast %cst_48 : f32 to vector<1x128xf32>
    %108 = arith.mulf %104, %107 : vector<1x128xf32>
    %109 = arith.mulf %106, %106 : vector<1x128xf32>
    %110 = arith.subf %108, %109 : vector<1x128xf32>
    %cst_49 = arith.constant 0.000000e+00 : f32
    %111 = vector.broadcast %cst_49 : f32 to vector<1x128xf32>
    %112 = arith.maximumf %110, %111 : vector<1x128xf32>
    %cst_50 = arith.constant 9.99999974E-6 : f32
    %113 = vector.broadcast %cst_50 : f32 to vector<1x128xf32>
    %114 = arith.addf %112, %113 : vector<1x128xf32>
    %115 = math.rsqrt %114 : vector<1x128xf32>
    %116 = arith.mulf %8, %115 : vector<1x128xf32>
    %117 = arith.mulf %106, %116 : vector<1x128xf32>
    %118 = arith.subf %9, %117 : vector<1x128xf32>
    %119 = vector.broadcast %116 : vector<1x128xf32> to vector<128x128xf32>
    %120 = arith.mulf %10, %119 : vector<128x128xf32>
    %121 = arith.truncf %120 : vector<128x128xf32> to vector<128x128xbf16>
    %cst_51 = arith.constant dense<0.000000e+00> : vector<1x128xf32>
    %122 = tpu.matmul %118, %10, %cst_51 {dimension_numbers = #tpu.dot_dimension_numbers<[1], [1], [0], [0], [0, 0, 1, 0], [], []>} : vector<1x128xf32>, vector<128x128xf32>, vector<1x128xf32> -> vector<1x128xf32>
    %123 = arith.addf %122, %11 : vector<1x128xf32>
    %124 = arith.truncf %99 : vector<6x128xf32> to vector<6x128xbf16>
    %cst_52 = arith.constant dense<0.000000e+00> : vector<6x128xf32>
    %125 = tpu.matmul %124, %121, %cst_52 {dimension_numbers = #tpu.dot_dimension_numbers<[1], [1], [0], [0], [0, 0, 1, 0], [], []>} : vector<6x128xbf16>, vector<128x128xbf16>, vector<6x128xf32> -> vector<6x128xf32>
    %126 = vector.broadcast %123 : vector<1x128xf32> to vector<6x128xf32>
    %127 = arith.addf %125, %126 : vector<6x128xf32>
    %c0_53 = arith.constant 0 : index
    %c0_54 = arith.constant 0 : index
    %128 = vector.load %arg13[%c0_53, %c0_54] : memref<6x128xf32, #tpu.memory_space<vmem>>, vector<6x128xf32>
    tpu.vector_store %arg13[%c0_53, %c0_54], %127 {strides = array<i32>} : memref<6x128xf32, #tpu.memory_space<vmem>>, vector<6x128xf32>,
    return
  }
}

</mosaic_0001>

<bundles_post_ra>
// kernel: _feedforward_forward.1
= control target key start
LH: loop header
LB: loop body
LE: loop exit
PB: predicated region body
PF: predicated region fallthrough
CT: control target
= control target key end

     0   :  { %18 = vsyncpa [#allocation3], 0  ;;  %s653_s28 = smov [#allocation2]   ;;  %s654_s30 = smov 128   ;;  %s1063_s0 = inlined_call_operand.vmem [shape: f32[6,16], index: 0, kind: input, shape index: {}]   ;;  %s1064_s1 = inlined_call_operand.vmem [shape: f32[1,16], index: 1, kind: input, shape index: {}]   ;;  %s1065_s2 = inlined_call_operand.vmem [shape: f32[1,16], index: 2, kind: input, shape index: {}]   ;;  %s1066_s3 = inlined_call_operand.vmem [shape: f32[128,16], index: 3, kind: input, shape index: {}]   ;;  %s1067_s4 = inlined_call_operand.vmem [shape: f32[1,128], index: 4, kind: input, shape index: {}]   ;;  %s1068_s5 = inlined_call_operand.vmem [shape: f32[1,128], index: 5, kind: input, shape index: {}]   ;;  %s1069_s6 = inlined_call_operand.vmem [shape: f32[1,128], index: 6, kind: input, shape index: {}]   ;;  %s1070_s7 = inlined_call_operand.vmem [shape: f32[128,128], index: 7, kind: input, shape index: {}]   ;;  %s1071_s8 = inlined_call_operand.vmem [shape: f32[1,128], index: 8, kind: input, shape index: {}]   ;;  %s1072_s9 = inlined_call_operand.vmem [shape: f32[1,128], index: 9, kind: input, shape index: {}]   ;;  %s1073_s10 = inlined_call_operand.vmem [shape: f32[1,128], index: 10, kind: input, shape index: {}]   ;;  %s1074_s11 = inlined_call_operand.hbm [shape: f32[128,128], index: 11, kind: input, shape index: {}]   ;;  %s1075_s12 = inlined_call_operand.vmem [shape: f32[1,128], index: 12, kind: input, shape index: {}]   ;;  %s1076_s13 = inlined_call_operand.vmem [shape: f32[6,128], index: 13, kind: output, shape index: {}]  }
   0x1   :  { %s45_s27 = sshll.u32 %s1074_s11, 4  ;;  %s47_s29 = sshll.u32 %s653_s28, 4  ;;  %s46_s27 = int_to_ptr.hbm [resolvable:$true] %s45_s27  ;;  %s48_s29 = int_to_ptr.vmem [resolvable:$true] %s47_s29 }
   0x2   :  { %s655_s14 = smov 8  }
   0x3   :  { %53 = dma.hbm_to_vmem [thread:$0]  %s46_s27, 2048, %s48_s29, [#allocation3], %s654_s30, %s654_s30, %s655_s14  }
   0x4   :  { %651 = dma.done.wait [#allocation3], 2048  }
   0x5   :  { %652 = vsyncadd [#allocation3], 4294965248  ;;  %vm118_vm0 = vcmask 128000   ;;  %v732_v0 = vld [vmem:[%s1063_s0] sm:$0x3f]  ;;  %v77_v13 = vld [vmem:[%s1066_s3 + $0x78] sm:$0xff] }
   0x6   :  { %v119_v1 = vsel %vm118_vm0, %v732_v0, 0.0  ;;  %v126_v2 = vmul.f32 %v732_v0, %v732_v0  ;;  %vm180_vm1 = vcmask 130048   ;;  %v76_v21 = vld [vmem:[%s1066_s3 + $0x70] sm:$0xff]  ;;  %v75_v23 = vld [vmem:[%s1066_s3 + $0x68] sm:$0xff]  ;;  %v74_v25 = vld [vmem:[%s1066_s3 + $0x60] sm:$0xff]  ;;  %vm295_vm5 = vcmask 1045504  }
   0x7   :  { %v120_v3 = vrot.slane %v119_v1, 4  ;;  %592 = vmatpush.xpose.msk.msra.mxu0 %vm180_vm1, %v77_v13  ;;  %v73_v26 = vld [vmem:[%s1066_s3 + $0x58] sm:$0xff]  ;;  %v72_v30 = vld [vmem:[%s1066_s3 + $0x50] sm:$0xff]  ;;  %v71_v32 = vld [vmem:[%s1066_s3 + $0x48] sm:$0xff] }
   0x8   :  { %v127_v4 = vsel %vm118_vm0, %v126_v2, 0.0  ;;  %v60_v34 = vld [vmem:[%s1064_s1] sm:$0x1]  ;;  %v69_v40 = vld [vmem:[%s1066_s3 + $0x38] sm:$0xff]  ;;  %v68_v47 = vld [vmem:[%s1066_s3 + $0x30] sm:$0xff] }
   0x9   :  { %v121_v5 = vadd.f32 %v120_v3, %v119_v1  ;;  %v128_v6 = vrot.slane %v127_v4, 4  ;;  %v70_v38 = vld [vmem:[%s1066_s3 + $0x40] sm:$0xff]  ;;  %v67_v49 = vld [vmem:[%s1066_s3 + $0x28] sm:$0xff]  ;;  %v65_v55 = vld [vmem:[%s1066_s3 + $0x18] sm:$0xff] }
   0xa   :  { %v66_v53 = vld [vmem:[%s1066_s3 + $0x20] sm:$0xff]  ;;  %v64_v59 = vld [vmem:[%s1066_s3 + $0x10] sm:$0xff]  ;;  %v63_v61 = vld [vmem:[%s1066_s3 + $0x8] sm:$0xff] }
   0xb   :  { %v122_v7 = vrot.slane %v121_v5, 2  ;;  %v129_v8 = vadd.f32 %v128_v6, %v127_v4  ;;  %593 = vmatpush.xpose.msk.msra.mxu0 %vm180_vm1, %v76_v21  ;;  %v62_v2 = vld [vmem:[%s1066_s3] sm:$0xff] }
   0xc   :  { %v61_v4 = vld [vmem:[%s1065_s2] sm:$0x1] }
   0xd   :  { %v123_v9 = vadd.f32 %v122_v7, %v121_v5  ;;  %v130_v10 = vrot.slane %v129_v8, 2 }
   0xf   :  { %v124_v11 = vrot.slane %v123_v9, 1  ;;  %v131_v12 = vadd.f32 %v130_v10, %v129_v8  ;;  %594 = vmatpush.xpose.msk.msra.mxu0 %vm180_vm1, %v75_v23  ;;  %v821_v10 = vld [vmem:[%s1070_s7 + $0x78] sm:$0xff] }
  0x10   :  { %357 = vmatpush.xpose.msra.mxu2 %v821_v10 }
  0x11   :  { %v125_v14 = vadd.f32 %v124_v11, %v123_v9  ;;  %v132_v15 = vrot.slane %v131_v12, 1 }
  0x13   :  { %v133_v16 = vadd.f32 %v132_v15, %v131_v12  ;;  %v740_v17 = vmul.f32 0.16666667, %v125_v14  ;;  %595 = vmatpush.xpose.msk.msra.mxu0 %vm180_vm1, %v74_v25 }
  0x15   :  { %v135_v18 = vmul.f32 0.16666667, %v133_v16  ;;  %v136_v19 = vmul.f32 %v740_v17, %v740_v17 }
  0x17   :  { %v137_v20 = vsub.f32 %v135_v18, %v136_v19  ;;  %596 = vmatpush.xpose.msk.msra.mxu0 %vm180_vm1, %v73_v26 }
  0x19   :  { %v138_v22 = vmax.f32 %v137_v20, 0.0 }
  0x1b   :  { %v139_v24 = vadd.f32 1e-05, %v138_v22  ;;  %597 = vmatpush.xpose.msk.msra.mxu0 %vm180_vm1, %v72_v30  ;;  %v834_v22 = vld [vmem:[%s1070_s7 + $0x70] sm:$0xff] }
  0x1c   :  { %358 = vmatpush.xpose.msra.mxu2 %v834_v22 }
  0x1d   :  { %613 = vrsqrt.f32 %v139_v24  ;;  %vm146_vm2 = vweird.f32 %v139_v24 }
  0x1f   :  { %598 = vmatpush.xpose.msk.msra.mxu0 %vm180_vm1, %v71_v32 }
  0x23   :  { %v614_v27 = vpop.eup %613  ;;  %599 = vmatpush.xpose.msk.msra.mxu0 %vm180_vm1, %v70_v38 }
  0x24   :  { %v141_v28 = vmul.f32 %v614_v27, %v139_v24  ;;  %vm147_vm3 = vweird.f32 %v614_v27  ;;  %v855_v24 = vld [vmem:[%s1070_s7 + $0x58] sm:$0xff] }
  0x25   :  { %vm148_vm4 = vmor %vm146_vm2, %vm147_vm3 }
  0x26   :  { %v142_v29 = vmul.f32 %v614_v27, %v141_v28  ;;  %v78_v28 = vld [vmem:[%s1067_s4] sm:$0x1] }
  0x27   :  { %600 = vmatpush.xpose.msk.msra.mxu0 %vm180_vm1, %v69_v40 }
  0x28   :  { %v143_v31 = vmul.f32 0.5, %v142_v29 }
  0x2a   :  { %v144_v33 = vsub.f32 1.5, %v143_v31 }
  0x2b   :  { %601 = vmatpush.xpose.msk.msra.mxu0 %vm180_vm1, %v68_v47 }
  0x2c   :  { %v145_v35 = vmul.f32 %v614_v27, %v144_v33 }
  0x2e   :  { %v149_v36 = vsel %vm148_vm4, %v614_v27, %v145_v35  ;;  %v876_v27 = vld [vmem:[%s1070_s7 + $0x40] sm:$0xff] }
  0x2f   :  { %v150_v37 = vmul.f32 %v149_v36, %v60_v34  ;;  %602 = vmatpush.xpose.msk.msra.mxu0 %vm180_vm1, %v67_v49  ;;  %v900_v34 = vld [vmem:[%s1070_s7 + $0x28] sm:$0xff] }
  0x31   :  { %v154_v39 = vperm.slane %v150_v37, 0  ;;  %v151_v3 = vmul.f32 %v150_v37, %v740_v17  ;;  %v907_v37 = vld [vmem:[%s1070_s7 + $0x20] sm:$0xff] }
  0x33   :  { %v171_v41 = vmul.f32 %v154_v39, %v77_v13  ;;  %v170_v42 = vmul.f32 %v154_v39, %v76_v21  ;;  %v169_v44 = vmul.f32 %v154_v39, %v75_v23  ;;  %v168_v45 = vmul.f32 %v154_v39, %v74_v25  ;;  %603 = vmatpush.xpose.msk.msra.mxu0 %vm180_vm1, %v66_v53  ;;  %v841_v23 = vld [vmem:[%s1070_s7 + $0x68] sm:$0xff]  ;;  %v862_v25 = vld [vmem:[%s1070_s7 + $0x50] sm:$0xff] }
  0x34   :  { %v167_v51 = vmul.f32 %v154_v39, %v73_v26  ;;  %v166_v52 = vmul.f32 %v154_v39, %v72_v30  ;;  %v165_v57 = vmul.f32 %v154_v39, %v71_v32  ;;  %v164_v58 = vmul.f32 %v154_v39, %v70_v38  ;;  %359 = vmatpush.xpose.msra.mxu2 %v841_v23  ;;  %v869_v26 = vld [vmem:[%s1070_s7 + $0x48] sm:$0xff]  ;;  %v886_v30 = vld [vmem:[%s1070_s7 + $0x38] sm:$0xff]  ;;  %v893_v32 = vld [vmem:[%s1070_s7 + $0x30] sm:$0xff] }
  0x35   :  { %v179_v43 = vpack.c.bf16 %v171_v41, %v170_v42  ;;  %v178_v48 = vpack.c.bf16 %v169_v44, %v168_v45  ;;  %v163_v63 = vmul.f32 %v154_v39, %v69_v40  ;;  %v162_v1 = vmul.f32 %v154_v39, %v68_v47  ;;  %v914_v38 = vld [vmem:[%s1070_s7 + $0x18] sm:$0xff] }
  0x36   :  { %v177_v54 = vpack.c.bf16 %v167_v51, %v166_v52  ;;  %v176_v60 = vpack.c.bf16 %v165_v57, %v164_v58  ;;  %v152_v6 = vsub.f32 %v61_v4, %v151_v3  ;;  %v161_v8 = vmul.f32 %v154_v39, %v67_v49 }
  0x37   :  { %v279_v46 = vsel %vm180_vm1, %v179_v43, 0  ;;  %v276_v50 = vsel %vm180_vm1, %v178_v48, 0  ;;  %604 = vmatpush.xpose.msk.msra.mxu0 %vm180_vm1, %v65_v55  ;;  %v175_v5 = vpack.c.bf16 %v163_v63, %v162_v1  ;;  %v160_v9 = vmul.f32 %v154_v39, %v66_v53  ;;  %v927_v43 = vld [vmem:[%s1070_s7 + $0x10] sm:$0xff]  ;;  %v935_v48 = vld [vmem:[%s1070_s7 + $0x8] sm:$0xff]  ;;  %v942_v53 = vld [vmem:[%s1070_s7] sm:$0xff] }
  0x38   :  { %281 = vmatpush.bf16.xpose.msra.mxu1 %v279_v46  ;;  %v273_v56 = vsel %vm180_vm1, %v177_v54, 0  ;;  %v270_v62 = vsel %vm180_vm1, %v176_v60, 0  ;;  %v159_v13 = vmul.f32 %v154_v39, %v65_v55  ;;  %v158_v14 = vmul.f32 %v154_v39, %v64_v59 }
  0x39   :  { %v267_v7 = vsel %vm180_vm1, %v175_v5, 0  ;;  %v174_v11 = vpack.c.bf16 %v161_v8, %v160_v9  ;;  %v157_v17 = vmul.f32 %v154_v39, %v63_v61  ;;  %v156_v18 = vmul.f32 %v154_v39, %v62_v2 }
  0x3a   :  { %v173_v15 = vpack.c.bf16 %v159_v13, %v158_v14  ;;  %v252_v21 = vpack.c.bf16 %v732_v0, %v732_v0  ;;  %v848_v0 = vld [vmem:[%s1070_s7 + $0x60] sm:$0xff] }
  0x3b   :  { %605 = vmatpush.xpose.msk.msra.mxu0 %vm180_vm1, %v64_v59  ;;  %v264_v12 = vsel %vm180_vm1, %v174_v11, 0  ;;  %v172_v19 = vpack.c.bf16 %v157_v17, %v156_v18  ;;  %360 = vmatpush.xpose.msra.mxu2 %v848_v0 }
  0x3c   :  { %v261_v16 = vsel %vm180_vm1, %v173_v15, 0 }
  0x3d   :  { %v258_v20 = vsel %vm180_vm1, %v172_v19, 0 }
  0x3f   :  { %606 = vmatpush.xpose.msk.msra.mxu0 %vm180_vm1, %v63_v61  ;;  %361 = vmatpush.xpose.msra.mxu2 %v855_v24 }
  0x40   :  { %282 = vmatpush.bf16.xpose.msra.mxu1 %v276_v50 }
  0x43   :  { %607 = vmatpush.xpose.msk.msra.mxu0 %vm180_vm1, %v62_v2  ;;  %362 = vmatpush.xpose.msra.mxu2 %v862_v25 }
  0x46   :  { %608 = vmatmul.msk.f32.vlgmr.msra.gmra.mxu0 %vm180_vm1, %v152_v6 }
  0x47   :  { %454 = vmatpush.xpose.msrb.mxu0 %v821_v10  ;;  %363 = vmatpush.xpose.msra.mxu2 %v869_v26 }
  0x48   :  { %283 = vmatpush.bf16.xpose.msra.mxu1 %v273_v56 }
  0x4b   :  { %455 = vmatpush.xpose.msrb.mxu0 %v834_v22  ;;  %364 = vmatpush.xpose.msra.mxu2 %v876_v27 }
  0x4f   :  { %456 = vmatpush.xpose.msrb.mxu0 %v841_v23  ;;  %365 = vmatpush.xpose.msra.mxu2 %v886_v30 }
  0x50   :  { %284 = vmatpush.bf16.xpose.msra.mxu1 %v270_v62 }
  0x53   :  { %457 = vmatpush.xpose.msrb.mxu0 %v848_v0  ;;  %366 = vmatpush.xpose.msra.mxu2 %v893_v32 }
  0x57   :  { %458 = vmatpush.xpose.msrb.mxu0 %v855_v24  ;;  %367 = vmatpush.xpose.msra.mxu2 %v900_v34 }
  0x58   :  { %285 = vmatpush.bf16.xpose.msra.mxu1 %v267_v7  ;;  %v949_v7 = vld [vmem:[%s1068_s5] sm:$0x1] }
  0x5b   :  { %459 = vmatpush.xpose.msrb.mxu0 %v862_v25  ;;  %368 = vmatpush.xpose.msra.mxu2 %v907_v37 }
  0x5f   :  { %460 = vmatpush.xpose.msrb.mxu0 %v869_v26  ;;  %369 = vmatpush.xpose.msra.mxu2 %v914_v38 }
  0x60   :  { %286 = vmatpush.bf16.xpose.msra.mxu1 %v264_v12  ;;  %v955_v12 = vld [vmem:[%s1069_s6] sm:$0x1] }
  0x63   :  { %461 = vmatpush.xpose.msrb.mxu0 %v876_v27  ;;  %370 = vmatpush.xpose.msra.mxu2 %v927_v43 }
  0x67   :  { %462 = vmatpush.xpose.msrb.mxu0 %v886_v30  ;;  %371 = vmatpush.xpose.msra.mxu2 %v935_v48 }
  0x68   :  { %287 = vmatpush.bf16.xpose.msra.mxu1 %v261_v16 }
  0x6b   :  { %463 = vmatpush.xpose.msrb.mxu0 %v893_v32  ;;  %372 = vmatpush.xpose.msra.mxu2 %v942_v53 }
  0x6f   :  { %464 = vmatpush.xpose.msrb.mxu0 %v900_v34 }
  0x70   :  { %288 = vmatpush.bf16.xpose.msra.mxu1 %v258_v20 }
  0x73   :  { %465 = vmatpush.xpose.msrb.mxu0 %v907_v37 }
  0x77   :  { %609 = vmatmul.msk.bf16.vlgmr.msra.gmra.mxu1 %vm180_vm1, %v252_v21  ;;  %466 = vmatpush.xpose.msrb.mxu0 %v914_v38 }
  0x7b   :  { %467 = vmatpush.xpose.msrb.mxu0 %v927_v43 }
  0x7f   :  { %468 = vmatpush.xpose.msrb.mxu0 %v935_v48 }
  0x83   :  { %469 = vmatpush.xpose.msrb.mxu0 %v942_v53 }
  0xc3   :  { %v249_v29 = vpop.f32.mrf.mxu0 }
  0xc4   :  { %v250_v31 = vadd.f32 %v249_v29, %v78_v28 }
  0xc6   :  { %v253_v33 = vperm.slane %v250_v31, 0 }
  0xf4   :  { %v290_v35 = vpop.f32.mrf.mxu1 }
  0xf5   :  { %v291_v36 = vadd.f32 %v290_v35, %v253_v33 }
  0xf7   :  { %615 = vtanh.f32 %v291_v36 }
  0xfc   :  { %v292_v39 = vpop.f32.mrf.mxu1 }
  0xfd   :  { %v916_v40 = vpop.eup %615 }
  0xfe   :  { %v303_v41 = vmul.f32 %v916_v40, %v916_v40  ;;  %v296_v42 = vsel %vm295_vm5, %v916_v40, 0.0 }
  0xff   :  { %v297_v44 = vrot.slane %v296_v42, 4 }
 0x100   :  { %v304_v45 = vsel %vm295_vm5, %v303_v41, 0.0 }
 0x101   :  { %v298_v46 = vadd.f32 %v297_v44, %v296_v42  ;;  %v305_v47 = vrot.slane %v304_v45, 4 }
 0x103   :  { %v299_v49 = vrot.slane %v298_v46, 2  ;;  %v306_v50 = vadd.f32 %v305_v47, %v304_v45 }
 0x105   :  { %v300_v51 = vadd.f32 %v299_v49, %v298_v46  ;;  %v307_v52 = vrot.slane %v306_v50, 2 }
 0x107   :  { %v301_v54 = vrot.slane %v300_v51, 1  ;;  %v308_v55 = vadd.f32 %v307_v52, %v306_v50 }
 0x109   :  { %v302_v56 = vadd.f32 %v301_v54, %v300_v51  ;;  %v309_v57 = vrot.slane %v308_v55, 1 }
 0x10b   :  { %v310_v58 = vadd.f32 %v309_v57, %v308_v55  ;;  %v311_v59 = vmul.f32 0.16666667, %v302_v56  ;;  %v377_v55 = vpack.c.bf16 %v916_v40, %v916_v40  ;;  %v979_v56 = vld [vmem:[%s1071_s8] sm:$0x1] }
 0x10d   :  { %v312_v60 = vmul.f32 0.16666667, %v310_v58  ;;  %v313_v61 = vmul.f32 %v311_v59, %v311_v59 }
 0x10f   :  { %v314_v62 = vsub.f32 %v312_v60, %v313_v61 }
 0x111   :  { %v315_v63 = vmax.f32 %v314_v62, 0.0 }
 0x113   :  { %v316_v1 = vadd.f32 1e-05, %v315_v63 }
 0x115   :  { %617 = vrsqrt.f32 %v316_v1  ;;  %vm323_vm7 = vweird.f32 %v316_v1 }
 0x11b   :  { %v618_v2 = vpop.eup %617 }
 0x11c   :  { %v318_v3 = vmul.f32 %v618_v2, %v316_v1  ;;  %vm324_vm6 = vweird.f32 %v618_v2 }
 0x11d   :  { %vm325_vm8 = vmor %vm323_vm7, %vm324_vm6 }
 0x11e   :  { %v319_v4 = vmul.f32 %v618_v2, %v318_v3 }
 0x120   :  { %v320_v5 = vmul.f32 0.5, %v319_v4 }
 0x122   :  { %v321_v6 = vsub.f32 1.5, %v320_v5 }
 0x124   :  { %v322_v8 = vmul.f32 %v618_v2, %v321_v6 }
 0x126   :  { %v326_v9 = vsel %vm325_vm8, %v618_v2, %v322_v8 }
 0x127   :  { %v327_v11 = vmul.f32 %v326_v9, %v949_v7 }
 0x129   :  { %v328_v13 = vmul.f32 %v327_v11, %v311_v59  ;;  %v331_v14 = vperm.slane %v327_v11, 0 }
 0x12b   :  { %v329_v15 = vsub.f32 %v955_v12, %v328_v13  ;;  %v347_v16 = vmul.f32 %v331_v14, %v834_v22  ;;  %v348_v17 = vmul.f32 %v331_v14, %v821_v10  ;;  %v345_v19 = vmul.f32 %v331_v14, %v848_v0 }
 0x12c   :  { %v346_v20 = vmul.f32 %v331_v14, %v841_v23  ;;  %v343_v28 = vmul.f32 %v331_v14, %v862_v25  ;;  %v344_v29 = vmul.f32 %v331_v14, %v855_v24  ;;  %v341_v33 = vmul.f32 %v331_v14, %v876_v27 }
 0x12d   :  { %373 = vmatmul.f32.vlgmr.msra.gmra.mxu2 %v329_v15  ;;  %v356_v18 = vpack.c.bf16 %v348_v17, %v347_v16  ;;  %v342_v35 = vmul.f32 %v331_v14, %v869_v26  ;;  %v339_v39 = vmul.f32 %v331_v14, %v893_v32  ;;  %v340_v41 = vmul.f32 %v331_v14, %v886_v30 }
 0x12e   :  { %v355_v21 = vpack.c.bf16 %v346_v20, %v345_v19  ;;  %v354_v31 = vpack.c.bf16 %v344_v29, %v343_v28  ;;  %v337_v44 = vmul.f32 %v331_v14, %v907_v37  ;;  %v338_v45 = vmul.f32 %v331_v14, %v900_v34 }
 0x12f   :  { %379 = vmatpush.bf16.xpose.msra.mxu3 %v356_v18  ;;  %v353_v36 = vpack.c.bf16 %v342_v35, %v341_v33  ;;  %v352_v42 = vpack.c.bf16 %v340_v41, %v339_v39  ;;  %v335_v47 = vmul.f32 %v331_v14, %v927_v43  ;;  %v336_v49 = vmul.f32 %v331_v14, %v914_v38 }
 0x130   :  { %v351_v46 = vpack.c.bf16 %v338_v45, %v337_v44  ;;  %v333_v51 = vmul.f32 %v331_v14, %v942_v53  ;;  %v334_v52 = vmul.f32 %v331_v14, %v935_v48 }
 0x131   :  { %v350_v50 = vpack.c.bf16 %v336_v49, %v335_v47 }
 0x132   :  { %v349_v54 = vpack.c.bf16 %v334_v52, %v333_v51 }
 0x137   :  { %380 = vmatpush.bf16.xpose.msra.mxu3 %v355_v21 }
 0x13f   :  { %381 = vmatpush.bf16.xpose.msra.mxu3 %v354_v31 }
 0x147   :  { %382 = vmatpush.bf16.xpose.msra.mxu3 %v353_v36 }
 0x14f   :  { %383 = vmatpush.bf16.xpose.msra.mxu3 %v352_v42 }
 0x157   :  { %384 = vmatpush.bf16.xpose.msra.mxu3 %v351_v46 }
 0x15f   :  { %385 = vmatpush.bf16.xpose.msra.mxu3 %v350_v50 }
 0x167   :  { %386 = vmatpush.bf16.xpose.msra.mxu3 %v349_v54 }
 0x16e   :  { %387 = vmatmul.bf16.vlgmr.msra.gmra.mxu3 %v377_v55 }
 0x1b0   :  { %v374_v57 = vpop.f32.mrf.mxu2 }
 0x1b1   :  { %v375_v58 = vadd.f32 %v374_v57, %v979_v56 }
 0x1b3   :  { %v378_v59 = vperm.slane %v375_v58, 0 }
 0x1f1   :  { %v388_v60 = vpop.f32.mrf.mxu3 }
 0x1f2   :  { %v389_v61 = vadd.f32 %v388_v60, %v378_v59 }
 0x1f4   :  { %619 = vtanh.f32 %v389_v61 }
 0x1f9   :  { %v390_v62 = vpop.f32.mrf.mxu3 }
 0x1fa   :  { %v982_v63 = vpop.eup %619 }
 0x1fb   :  { %v400_v1 = vmul.f32 %v982_v63, %v982_v63  ;;  %v393_v40 = vsel %vm295_vm5, %v982_v63, 0.0 }
 0x1fc   :  { %v394_v2 = vrot.slane %v393_v40, 4 }
 0x1fd   :  { %v401_v3 = vsel %vm295_vm5, %v400_v1, 0.0 }
 0x1fe   :  { %v402_v4 = vrot.slane %v401_v3, 4  ;;  %v395_v5 = vadd.f32 %v394_v2, %v393_v40  ;;  %v1030_v2 = vld [vmem:[#allocation2 + $0x40] sm:$0xff] }
 0x200   :  { %v396_v6 = vrot.slane %v395_v5, 2  ;;  %v403_v8 = vadd.f32 %v402_v4, %v401_v3  ;;  %v107_v4 = vld [vmem:[#allocation2 + $0x38] sm:$0xff] }
 0x202   :  { %v397_v9 = vadd.f32 %v396_v6, %v395_v5  ;;  %v404_v11 = vrot.slane %v403_v8, 2 }
 0x204   :  { %v398_v13 = vrot.slane %v397_v9, 1  ;;  %v405_v14 = vadd.f32 %v404_v11, %v403_v8  ;;  %v105_v11 = vld [vmem:[#allocation2 + $0x28] sm:$0xff] }
 0x206   :  { %v399_v15 = vadd.f32 %v398_v13, %v397_v9  ;;  %v406_v16 = vrot.slane %v405_v14, 1  ;;  %v106_v9 = vld [vmem:[#allocation2 + $0x30] sm:$0xff] }
 0x208   :  { %v407_v17 = vadd.f32 %v406_v16, %v405_v14  ;;  %v408_v18 = vmul.f32 0.16666667, %v399_v15  ;;  %v104_v16 = vld [vmem:[#allocation2 + $0x20] sm:$0xff] }
 0x20a   :  { %v409_v19 = vmul.f32 0.16666667, %v407_v17  ;;  %v410_v20 = vmul.f32 %v408_v18, %v408_v18 }
 0x20c   :  { %v411_v21 = vsub.f32 %v409_v19, %v410_v20 }
 0x20e   :  { %v412_v28 = vmax.f32 %v411_v21, 0.0  ;;  %v103_v21 = vld [vmem:[#allocation2 + $0x18] sm:$0xff] }
 0x210   :  { %v413_v29 = vadd.f32 1e-05, %v412_v28 }
 0x212   :  { %621 = vrsqrt.f32 %v413_v29  ;;  %vm420_vm10 = vweird.f32 %v413_v29 }
 0x218   :  { %v622_v31 = vpop.eup %621 }
 0x219   :  { %v415_v33 = vmul.f32 %v622_v31, %v413_v29  ;;  %vm421_vm9 = vweird.f32 %v622_v31 }
 0x21a   :  { %vm422_vm11 = vmor %vm420_vm10, %vm421_vm9 }
 0x21b   :  { %v416_v35 = vmul.f32 %v622_v31, %v415_v33 }
 0x21d   :  { %v417_v36 = vmul.f32 0.5, %v416_v35  ;;  %v102_v35 = vld [vmem:[#allocation2 + $0x10] sm:$0xff] }
 0x21f   :  { %v418_v39 = vsub.f32 1.5, %v417_v36 }
 0x221   :  { %v419_v41 = vmul.f32 %v622_v31, %v418_v39 }
 0x223   :  { %v423_v42 = vsel %vm422_vm11, %v622_v31, %v419_v41 }
 0x224   :  { %v424_v44 = vmul.f32 %v423_v42, %v949_v7 }
 0x226   :  { %v425_v45 = vmul.f32 %v424_v44, %v408_v18  ;;  %v428_v46 = vperm.slane %v424_v44, 0  ;;  %v101_v44 = vld [vmem:[#allocation2 + $0x8] sm:$0xff] }
 0x228   :  { %v426_v47 = vsub.f32 %v955_v12, %v425_v45  ;;  %v444_v49 = vmul.f32 %v428_v46, %v834_v22  ;;  %v445_v50 = vmul.f32 %v428_v46, %v821_v10  ;;  %v442_v52 = vmul.f32 %v428_v46, %v848_v0 }
 0x229   :  { %v443_v54 = vmul.f32 %v428_v46, %v841_v23  ;;  %v440_v57 = vmul.f32 %v428_v46, %v862_v25  ;;  %v441_v7 = vmul.f32 %v428_v46, %v855_v24  ;;  %v438_v12 = vmul.f32 %v428_v46, %v876_v27 }
 0x22a   :  { %470 = vmatmul.f32.vlgmr.msrb.gmra.mxu0 %v426_v47  ;;  %v453_v51 = vpack.c.bf16 %v445_v50, %v444_v49  ;;  %v439_v22 = vmul.f32 %v428_v46, %v869_v26  ;;  %v436_v59 = vmul.f32 %v428_v46, %v893_v32  ;;  %v437_v0 = vmul.f32 %v428_v46, %v886_v30  ;;  %v100_v50 = vld [vmem:[#allocation2] sm:$0xff] }
 0x22b   :  { %v452_v55 = vpack.c.bf16 %v443_v54, %v442_v52  ;;  %v451_v58 = vpack.c.bf16 %v441_v7, %v440_v57  ;;  %v434_v23 = vmul.f32 %v428_v46, %v907_v37  ;;  %v435_v25 = vmul.f32 %v428_v46, %v900_v34  ;;  %v1009_v37 = vld [vmem:[#allocation2 + $0x78] sm:$0xff]  ;;  %v1012_v34 = vld [vmem:[#allocation2 + $0x70] sm:$0xff] }
 0x22c   :  { %476 = vmatpush.bf16.xpose.msrb.mxu1 %v453_v51  ;;  %v450_v10 = vpack.c.bf16 %v439_v22, %v438_v12  ;;  %v449_v60 = vpack.c.bf16 %v437_v0, %v436_v59  ;;  %v432_v24 = vmul.f32 %v428_v46, %v927_v43  ;;  %v433_v27 = vmul.f32 %v428_v46, %v914_v38  ;;  %v1015_v38 = vld [vmem:[#allocation2 + $0x68] sm:$0xff]  ;;  %v1018_v43 = vld [vmem:[#allocation2 + $0x60] sm:$0xff] }
 0x22d   :  { %v448_v61 = vpack.c.bf16 %v435_v25, %v434_v23  ;;  %v430_v26 = vmul.f32 %v428_v46, %v942_v53  ;;  %v431_v32 = vmul.f32 %v428_v46, %v935_v48  ;;  %v474_v30 = vpack.c.bf16 %v982_v63, %v982_v63  ;;  %551 = vmatpush.xpose.msrb.mxu2 %v1009_v37  ;;  %v1021_v48 = vld [vmem:[#allocation2 + $0x58] sm:$0xff]  ;;  %v1024_v53 = vld [vmem:[#allocation2 + $0x50] sm:$0xff]  ;;  %v1027_v63 = vld [vmem:[#allocation2 + $0x48] sm:$0xff] }
 0x22e   :  { %v447_v62 = vpack.c.bf16 %v433_v27, %v432_v24  ;;  %v98_v22 = vld [vmem:[%s1072_s9] sm:$0x1] }
 0x22f   :  { %v446_v1 = vpack.c.bf16 %v431_v32, %v430_v26  ;;  %v99_v25 = vld [vmem:[%s1073_s10] sm:$0x1] }
 0x231   :  { %552 = vmatpush.xpose.msrb.mxu2 %v1012_v34 }
 0x234   :  { %477 = vmatpush.bf16.xpose.msrb.mxu1 %v452_v55 }
 0x235   :  { %553 = vmatpush.xpose.msrb.mxu2 %v1015_v38 }
 0x239   :  { %554 = vmatpush.xpose.msrb.mxu2 %v1018_v43 }
 0x23c   :  { %478 = vmatpush.bf16.xpose.msrb.mxu1 %v451_v58 }
 0x23d   :  { %555 = vmatpush.xpose.msrb.mxu2 %v1021_v48 }
 0x241   :  { %556 = vmatpush.xpose.msrb.mxu2 %v1024_v53 }
 0x244   :  { %479 = vmatpush.bf16.xpose.msrb.mxu1 %v450_v10 }
 0x245   :  { %557 = vmatpush.xpose.msrb.mxu2 %v1027_v63 }
 0x249   :  { %558 = vmatpush.xpose.msrb.mxu2 %v1030_v2 }
 0x24c   :  { %480 = vmatpush.bf16.xpose.msrb.mxu1 %v449_v60 }
 0x24d   :  { %559 = vmatpush.xpose.msrb.mxu2 %v107_v4 }
 0x251   :  { %560 = vmatpush.xpose.msrb.mxu2 %v106_v9 }
 0x254   :  { %481 = vmatpush.bf16.xpose.msrb.mxu1 %v448_v61 }
 0x255   :  { %561 = vmatpush.xpose.msrb.mxu2 %v105_v11 }
 0x259   :  { %562 = vmatpush.xpose.msrb.mxu2 %v104_v16 }
 0x25c   :  { %482 = vmatpush.bf16.xpose.msrb.mxu1 %v447_v62 }
 0x25d   :  { %563 = vmatpush.xpose.msrb.mxu2 %v103_v21 }
 0x261   :  { %564 = vmatpush.xpose.msrb.mxu2 %v102_v35 }
 0x264   :  { %483 = vmatpush.bf16.xpose.msrb.mxu1 %v446_v1 }
 0x265   :  { %565 = vmatpush.xpose.msrb.mxu2 %v101_v44 }
 0x269   :  { %566 = vmatpush.xpose.msrb.mxu2 %v100_v50 }
 0x26b   :  { %484 = vmatmul.bf16.vlgmr.msrb.gmra.mxu1 %v474_v30 }
 0x2a7   :  { %v471_v40 = vpop.f32.mrf.mxu0 }
 0x2a8   :  { %v472_v3 = vadd.f32 %v471_v40, %v979_v56 }
 0x2aa   :  { %v475_v5 = vperm.slane %v472_v3, 0 }
 0x2e8   :  { %v485_v6 = vpop.f32.mrf.mxu1 }
 0x2e9   :  { %v486_v8 = vadd.f32 %v485_v6, %v475_v5 }
 0x2eb   :  { %623 = vtanh.f32 %v486_v8 }
 0x2f0   :  { %v487_v13 = vpop.f32.mrf.mxu1 }
 0x2f1   :  { %v1034_v14 = vpop.eup %623 }
 0x2f2   :  { %v490_v15 = vsel %vm295_vm5, %v1034_v14, 0.0  ;;  %v497_v56 = vmul.f32 %v1034_v14, %v1034_v14 }
 0x2f3   :  { %v491_v17 = vrot.slane %v490_v15, 4 }
 0x2f4   :  { %v498_v18 = vsel %vm295_vm5, %v497_v56, 0.0 }
 0x2f5   :  { %v492_v19 = vadd.f32 %v491_v17, %v490_v15  ;;  %v499_v20 = vrot.slane %v498_v18, 4 }
 0x2f7   :  { %v493_v28 = vrot.slane %v492_v19, 2  ;;  %v500_v29 = vadd.f32 %v499_v20, %v498_v18 }
 0x2f9   :  { %v494_v31 = vadd.f32 %v493_v28, %v492_v19  ;;  %v501_v33 = vrot.slane %v500_v29, 2 }
 0x2fb   :  { %v495_v36 = vrot.slane %v494_v31, 1  ;;  %v502_v39 = vadd.f32 %v501_v33, %v500_v29 }
 0x2fd   :  { %v496_v41 = vadd.f32 %v495_v36, %v494_v31  ;;  %v503_v42 = vrot.slane %v502_v39, 1 }
 0x2ff   :  { %v504_v45 = vadd.f32 %v503_v42, %v502_v39  ;;  %v505_v46 = vmul.f32 0.16666667, %v496_v41 }
 0x301   :  { %v506_v47 = vmul.f32 0.16666667, %v504_v45  ;;  %v507_v49 = vmul.f32 %v505_v46, %v505_v46 }
 0x303   :  { %v508_v51 = vsub.f32 %v506_v47, %v507_v49 }
 0x305   :  { %v509_v52 = vmax.f32 %v508_v51, 0.0 }
 0x307   :  { %v510_v54 = vadd.f32 1e-05, %v509_v52 }
 0x309   :  { %625 = vrsqrt.f32 %v510_v54  ;;  %vm517_vm13 = vweird.f32 %v510_v54 }
 0x30f   :  { %v626_v55 = vpop.eup %625 }
 0x310   :  { %v512_v57 = vmul.f32 %v626_v55, %v510_v54  ;;  %vm518_vm12 = vweird.f32 %v626_v55 }
 0x311   :  { %vm519_vm14 = vmor %vm517_vm13, %vm518_vm12 }
 0x312   :  { %v513_v7 = vmul.f32 %v626_v55, %v512_v57 }
 0x314   :  { %v514_v58 = vmul.f32 0.5, %v513_v7 }
 0x316   :  { %v515_v12 = vsub.f32 1.5, %v514_v58 }
 0x318   :  { %v516_v10 = vmul.f32 %v626_v55, %v515_v12 }
 0x31a   :  { %v520_v59 = vsel %vm519_vm14, %v626_v55, %v516_v10 }
 0x31b   :  { %v521_v0 = vmul.f32 %v520_v59, %v98_v22 }
 0x31d   :  { %v525_v60 = vperm.slane %v521_v0, 0  ;;  %v522_v23 = vmul.f32 %v521_v0, %v505_v46 }
 0x31f   :  { %v534_v61 = vmul.f32 %v525_v60, %v107_v4  ;;  %v533_v24 = vmul.f32 %v525_v60, %v106_v9  ;;  %v532_v27 = vmul.f32 %v525_v60, %v105_v11  ;;  %v531_v62 = vmul.f32 %v525_v60, %v104_v16 }
 0x320   :  { %v530_v26 = vmul.f32 %v525_v60, %v103_v21  ;;  %v529_v32 = vmul.f32 %v525_v60, %v102_v35  ;;  %v528_v1 = vmul.f32 %v525_v60, %v101_v44  ;;  %v527_v30 = vmul.f32 %v525_v60, %v100_v50 }
 0x321   :  { %v523_v40 = vsub.f32 %v99_v25, %v522_v23  ;;  %v541_v3 = vmul.f32 %v525_v60, %v1012_v34  ;;  %v542_v5 = vmul.f32 %v525_v60, %v1009_v37  ;;  %v546_v6 = vpack.c.bf16 %v534_v61, %v533_v24 }
 0x322   :  { %v545_v8 = vpack.c.bf16 %v532_v27, %v531_v62  ;;  %v544_v13 = vpack.c.bf16 %v530_v26, %v529_v32  ;;  %v543_v15 = vpack.c.bf16 %v528_v1, %v527_v30  ;;  %v540_v4 = vmul.f32 %v525_v60, %v1015_v38 }
 0x323   :  { %567 = vmatmul.f32.vlgmr.msrb.gmra.mxu2 %v523_v40  ;;  %v550_v56 = vpack.c.bf16 %v542_v5, %v541_v3  ;;  %v539_v9 = vmul.f32 %v525_v60, %v1018_v43  ;;  %v538_v16 = vmul.f32 %v525_v60, %v1021_v48  ;;  %v537_v17 = vmul.f32 %v525_v60, %v1024_v53  ;;  %v116_v43 = vld [vmem:[%s1075_s12] sm:$0x1] }
 0x324   :  { %v536_v37 = vmul.f32 %v525_v60, %v1027_v63  ;;  %v535_v18 = vmul.f32 %v525_v60, %v1030_v2  ;;  %v571_v38 = vpack.c.bf16 %v1034_v14, %v1034_v14 }
 0x325   :  { %573 = vmatpush.bf16.xpose.msrb.mxu3 %v550_v56  ;;  %v549_v11 = vpack.c.bf16 %v540_v4, %v539_v9  ;;  %v548_v34 = vpack.c.bf16 %v538_v16, %v537_v17 }
 0x326   :  { %v547_v19 = vpack.c.bf16 %v536_v37, %v535_v18 }
 0x32d   :  { %574 = vmatpush.bf16.xpose.msrb.mxu3 %v549_v11 }
 0x335   :  { %575 = vmatpush.bf16.xpose.msrb.mxu3 %v548_v34 }
 0x33d   :  { %576 = vmatpush.bf16.xpose.msrb.mxu3 %v547_v19 }
 0x345   :  { %577 = vmatpush.bf16.xpose.msrb.mxu3 %v546_v6 }
 0x34d   :  { %578 = vmatpush.bf16.xpose.msrb.mxu3 %v545_v8 }
 0x355   :  { %579 = vmatpush.bf16.xpose.msrb.mxu3 %v544_v13 }
 0x35d   :  { %580 = vmatpush.bf16.xpose.msrb.mxu3 %v543_v15 }
 0x364   :  { %581 = vmatmul.bf16.vlgmr.msrb.gmra.mxu3 %v571_v38 }
 0x3a6   :  { %v568_v48 = vpop.f32.mrf.mxu2 }
 0x3a7   :  { %v569_v53 = vadd.f32 %v568_v48, %v116_v43 }
 0x3a9   :  { %v572_v20 = vperm.slane %v569_v53, 0 }
 0x3e7   :  { %v582_v63 = vpop.f32.mrf.mxu3 }
 0x3e8   :  { %v583_v21 = vadd.f32 %v582_v63, %v572_v20 }
 0x3ea   :  { %586 = vst [vmem:[%s1076_s13] sm:$0x3f] %v583_v21 }
 0x3ef   :  { %v584_v2 = vpop.f32.mrf.mxu3 }
 0x3f0   :  { %591 = vsyncpa [#allocation3], 1 }

</bundles_post_ra>
